<compile_context>
chip_gen: v7x
topology: tpu7x:2x2x1
jax: 0.10.0
libtpu: 0.0.40
codegen_flags: <defaults>
</compile_context>

<pallas_src>
import functools

import jax
import jax.numpy as jnp
from jax.experimental import pallas as pl
from jax.experimental.pallas import tpu as pltpu


def _round_up(x, m):
    return ((x + m - 1) // m) * m


def _critic_kernel(xu_ref, w1_ref, b1_ref, w2_ref, b2_ref, w3_ref, b3_ref, q_ref):
    """Fused twin-Q MLP on one [block_b, in_dim] batch tile."""
    cdt = w1_ref.dtype                       # matmul input dtype (f32 or bf16)
    xu = xu_ref[...].astype(cdt)

    # layer 1+4 (fused): [block_b, in_dim] @ [in_dim, 2H] -> f32
    h = jnp.dot(xu, w1_ref[...], preferred_element_type=jnp.float32) + b1_ref[...]
    h = jnp.maximum(h, 0.0)

    # layer 2+5 (block-diagonal): [block_b, 2H] @ [2H, 2H] -> f32
    h = jnp.dot(h.astype(cdt), w2_ref[...],
                preferred_element_type=jnp.float32) + b2_ref[...]
    h = jnp.maximum(h, 0.0)

    # layer 3+6 (block-diagonal): [block_b, 2H] @ [2H, 2] -> f32, q=[q1|q2]
    q = jnp.dot(h.astype(cdt), w3_ref[...],
                preferred_element_type=jnp.float32) + b3_ref[...]
    q_ref[...] = q.astype(q_ref.dtype)


def critic_forward(x, u, params, *, block_b_max=512):
    """Twin-Q critic forward. x: [B, num_inputs], u: [B, action_space].

    Returns (q1, q2), each [B, 1] float32 (matches PyTorch Critic.forward).
    """
    xu = jnp.concatenate([x.astype(jnp.float32), u.astype(jnp.float32)], axis=1)
    B, in_dim = xu.shape
    H = params["w1"].shape[1]
    wdt = params["w1"].dtype

    # ---- pack the twin heads into 3 fused weight matrices (cheap XLA glue) ----
    zH = jnp.zeros((H, H), wdt)
    z1 = jnp.zeros((H, 1), wdt)
    W1 = jnp.concatenate([params["w1"], params["w4"]], axis=1)               # [in_dim, 2H]
    B1 = jnp.concatenate([params["b1"], params["b4"]], axis=1).astype(jnp.float32)
    W2 = jnp.concatenate(
        [jnp.concatenate([params["w2"], zH], axis=1),
         jnp.concatenate([zH, params["w5"]], axis=1)], axis=0)               # [2H, 2H]
    B2 = jnp.concatenate([params["b2"], params["b5"]], axis=1).astype(jnp.float32)
    W3 = jnp.concatenate(
        [jnp.concatenate([params["w3"], z1], axis=1),
         jnp.concatenate([z1, params["w6"]], axis=1)], axis=0)               # [2H, 2]
    B3 = jnp.concatenate([params["b3"], params["b6"]], axis=1).astype(jnp.float32)

    # ---- batch tiling: sublane-aligned block, pad B as needed ----
    B8 = _round_up(max(B, 1), 8)
    block_b = min(block_b_max, B8)
    padded_B = _round_up(B, block_b)
    if padded_B != B:
        xu = jnp.pad(xu, ((0, padded_B - B), (0, 0)))
    grid = (padded_B // block_b,)

    def resident(arr):
        # Whole array stays VMEM-resident; constant block index => no re-DMA.
        return pl.BlockSpec(arr.shape, lambda i: (0, 0))

    in_specs = [
        pl.BlockSpec((block_b, in_dim), lambda i: (i, 0)),   # xu streams per block
        resident(W1), resident(B1),
        resident(W2), resident(B2),
        resident(W3), resident(B3),
    ]
    out_spec = pl.BlockSpec((block_b, 2), lambda i: (i, 0))  # lane-packed [q1|q2]

    # ---- VMEM budget + cost hint sized from the actual footprint ----
    wbytes = ((W1.size + W2.size + W3.size) * jnp.dtype(wdt).itemsize
              + (B1.size + B2.size + B3.size) * 4)
    stream_bytes = 2 * block_b * (in_dim + 2) * 4            # double-buffered xu + q
    scratch_bytes = 2 * block_b * 2 * H * 4                  # f32 intermediates
    vmem_limit = int(min(max(4 * (wbytes + stream_bytes + scratch_bytes), 4 << 20),
                         32 << 20))

    flops = 2 * padded_B * (in_dim * 2 * H + (2 * H) * (2 * H) + 2 * H * 2)
    bytes_accessed = padded_B * in_dim * 4 + wbytes + padded_B * 2 * 4

    q = pl.pallas_call(
        _critic_kernel,
        grid=grid,
        out_shape=jax.ShapeDtypeStruct((padded_B, 2), jnp.float32),
        in_specs=in_specs,
        out_specs=out_spec,
        compiler_params=pltpu.CompilerParams(
            dimension_semantics=("parallel",),       # megacore-shardable on v7x
            vmem_limit_bytes=vmem_limit),
        cost_estimate=pl.CostEstimate(
            flops=int(flops), transcendentals=0,
            bytes_accessed=int(bytes_accessed)),
    )(xu, W1, B1, W2, B2, W3, B3)

    q = q[:B]
    return q[:, 0:1], q[:, 1:2]


def init_critic_params(key, num_inputs, action_space, hidden_size,
                       weight_dtype=jnp.float32):
    """PyTorch-Linear-style init: uniform(-1/sqrt(fan_in), +1/sqrt(fan_in)).

    Weights stored as [in_features, out_features] (transposed vs torch).
    """
    in_dim = num_inputs + action_space
    layer_dims = [
        (in_dim, hidden_size),       # layer_1
        (hidden_size, hidden_size),  # layer_2
        (hidden_size, 1),            # layer_3
        (in_dim, hidden_size),       # layer_4
        (hidden_size, hidden_size),  # layer_5
        (hidden_size, 1),            # layer_6
    ]
    params = {}
    keys = jax.random.split(key, 2 * len(layer_dims))
    for i, (fan_in, fan_out) in enumerate(layer_dims, start=1):
        bound = 1.0 / (fan_in ** 0.5)
        wk, bk = keys[2 * (i - 1)], keys[2 * (i - 1) + 1]
        w = jax.random.uniform(wk, (fan_in, fan_out), jnp.float32,
                               minval=-bound, maxval=bound)
        b = jax.random.uniform(bk, (1, fan_out), jnp.float32,
                               minval=-bound, maxval=bound)
        params[f"w{i}"] = w.astype(weight_dtype)
        params[f"b{i}"] = b                      # biases kept in f32
    return params


def _reference_forward(x, u, params):
    """Plain-JAX reference matching PyTorch semantics exactly (f32)."""
    f32 = lambda a: a.astype(jnp.float32)
    xu = jnp.concatenate([f32(x), f32(u)], axis=1)
    h1 = jax.nn.relu(xu @ f32(params["w1"]) + params["b1"])
    h1 = jax.nn.relu(h1 @ f32(params["w2"]) + params["b2"])
    q1 = h1 @ f32(params["w3"]) + params["b3"]
    h2 = jax.nn.relu(xu @ f32(params["w4"]) + params["b4"])
    h2 = jax.nn.relu(h2 @ f32(params["w5"]) + params["b5"])
    q2 = h2 @ f32(params["w6"]) + params["b6"]
    return q1, q2


if __name__ == "__main__":
    num_inputs = 12
    action_space = 4
    hidden_size = 32

    key = jax.random.PRNGKey(0)
    kx, ku, kp = jax.random.split(key, 3)

    # --- small shape consistent with the module (the spec's forward) ---
    batch = 2
    x = jax.random.normal(kx, (batch, num_inputs), jnp.float32)
    u = jax.random.normal(ku, (batch, action_space), jnp.float32)
    params = init_critic_params(kp, num_inputs, action_space, hidden_size)

    q1, q2 = critic_forward(x, u, params)
    q1 = jax.block_until_ready(q1)
    q2 = jax.block_until_ready(q2)
    r1, r2 = _reference_forward(x, u, params)
    assert q1.shape == (batch, 1) and q2.shape == (batch, 1)
    assert jnp.allclose(q1, r1, atol=1e-5, rtol=1e-5)
    assert jnp.allclose(q2, r2, atol=1e-5, rtol=1e-5)

    # --- larger, non-aligned batch: exercises padding + multi-block grid ---
    batch2 = 300
    x2 = jax.random.normal(kx, (batch2, num_inputs), jnp.float32)
    u2 = jax.random.normal(ku, (batch2, action_space), jnp.float32)
    q1b, q2b = critic_forward(x2, u2, params, block_b_max=128)   # grid of 3 blocks
    q1b = jax.block_until_ready(q1b)
    q2b = jax.block_until_ready(q2b)
    r1b, r2b = _reference_forward(x2, u2, params)
    assert q1b.shape == (batch2, 1) and q2b.shape == (batch2, 1)
    assert jnp.allclose(q1b, r1b, atol=1e-5, rtol=1e-5)
    assert jnp.allclose(q2b, r2b, atol=1e-5, rtol=1e-5)

    # --- bf16-weight path (v6e/v7x MXU rate, f32 accumulate): loose check ---
    params_bf16 = init_critic_params(kp, num_inputs, action_space, hidden_size,
                                     weight_dtype=jnp.bfloat16)
    q1c, q2c = critic_forward(x2, u2, params_bf16)
    q1c = jax.block_until_ready(q1c)
    q2c = jax.block_until_ready(q2c)
    assert jnp.all(jnp.isfinite(q1c)) and jnp.all(jnp.isfinite(q2c))
    assert jnp.allclose(q1c, r1b, atol=2e-1, rtol=2e-1)
    assert jnp.allclose(q2c, r2b, atol=2e-1, rtol=2e-1)

    print("KERNEL_OK")
</pallas_src>

<mosaic_0001>
module attributes {stable_mosaic.version = 11 : i64} {
  func.func @_critic_kernel(%arg0: i32, %arg1: memref<8x16xf32, #tpu.memory_space<vmem>>, %arg2: memref<16x64xf32, #tpu.memory_space<vmem>>, %arg3: memref<1x64xf32, #tpu.memory_space<vmem>>, %arg4: memref<64x64xf32, #tpu.memory_space<vmem>>, %arg5: memref<1x64xf32, #tpu.memory_space<vmem>>, %arg6: memref<64x2xf32, #tpu.memory_space<vmem>>, %arg7: memref<1x2xf32, #tpu.memory_space<vmem>>, %arg8: memref<8x2xf32, #tpu.memory_space<vmem>>) attributes {dimension_semantics = [#tpu.dimension_semantics<parallel>], iteration_bounds = array<i64: 1>, scalar_prefetch = 0 : i64, scratch_operands = 0 : i64, tpu.core_type = #tpu.core_type<tc>, window_params = [{transform_indices = @transform_0, window_bounds = array<i64: 8, 16>}, {pipeline_mode = #tpu.pipeline_mode<synchronous>, transform_indices = @transform_1, window_bounds = array<i64: 16, 64>}, {pipeline_mode = #tpu.pipeline_mode<synchronous>, transform_indices = @transform_2, window_bounds = array<i64: 1, 64>}, {pipeline_mode = #tpu.pipeline_mode<synchronous>, transform_indices = @transform_3, window_bounds = array<i64: 64, 64>}, {pipeline_mode = #tpu.pipeline_mode<synchronous>, transform_indices = @transform_4, window_bounds = array<i64: 1, 64>}, {pipeline_mode = #tpu.pipeline_mode<synchronous>, transform_indices = @transform_5, window_bounds = array<i64: 64, 2>}, {pipeline_mode = #tpu.pipeline_mode<synchronous>, transform_indices = @transform_6, window_bounds = array<i64: 1, 2>}, {transform_indices = @transform_7, window_bounds = array<i64: 8, 2>}]} {
    %c0 = arith.constant 0 : index
    %c0_0 = arith.constant 0 : index
    %0 = vector.load %arg1[%c0, %c0_0] : memref<8x16xf32, #tpu.memory_space<vmem>>, vector<8x16xf32>
    %c0_1 = arith.constant 0 : index
    %c0_2 = arith.constant 0 : index
    %1 = vector.load %arg2[%c0_1, %c0_2] : memref<16x64xf32, #tpu.memory_space<vmem>>, vector<16x64xf32>
    %cst = arith.constant dense<0.000000e+00> : vector<8x64xf32>
    %2 = tpu.matmul %0, %1, %cst {dimension_numbers = #tpu.dot_dimension_numbers<[1], [0], [0], [1], [0, 0, 1, 1], [], []>} : vector<8x16xf32>, vector<16x64xf32>, vector<8x64xf32> -> vector<8x64xf32>
    %c0_3 = arith.constant 0 : index
    %c0_4 = arith.constant 0 : index
    %3 = vector.load %arg3[%c0_3, %c0_4] : memref<1x64xf32, #tpu.memory_space<vmem>>, vector<1x64xf32>
    %4 = vector.broadcast %3 : vector<1x64xf32> to vector<8x64xf32>
    %5 = arith.addf %2, %4 : vector<8x64xf32>
    %cst_5 = arith.constant 0.000000e+00 : f32
    %6 = vector.broadcast %cst_5 : f32 to vector<8x64xf32>
    %7 = arith.maximumf %5, %6 : vector<8x64xf32>
    %c0_6 = arith.constant 0 : index
    %c0_7 = arith.constant 0 : index
    %8 = vector.load %arg4[%c0_6, %c0_7] : memref<64x64xf32, #tpu.memory_space<vmem>>, vector<64x64xf32>
    %cst_8 = arith.constant dense<0.000000e+00> : vector<8x64xf32>
    %9 = tpu.matmul %7, %8, %cst_8 {dimension_numbers = #tpu.dot_dimension_numbers<[1], [0], [0], [1], [0, 0, 1, 1], [], []>} : vector<8x64xf32>, vector<64x64xf32>, vector<8x64xf32> -> vector<8x64xf32>
    %c0_9 = arith.constant 0 : index
    %c0_10 = arith.constant 0 : index
    %10 = vector.load %arg5[%c0_9, %c0_10] : memref<1x64xf32, #tpu.memory_space<vmem>>, vector<1x64xf32>
    %11 = vector.broadcast %10 : vector<1x64xf32> to vector<8x64xf32>
    %12 = arith.addf %9, %11 : vector<8x64xf32>
    %cst_11 = arith.constant 0.000000e+00 : f32
    %13 = vector.broadcast %cst_11 : f32 to vector<8x64xf32>
    %14 = arith.maximumf %12, %13 : vector<8x64xf32>
    %c0_12 = arith.constant 0 : index
    %c0_13 = arith.constant 0 : index
    %15 = vector.load %arg6[%c0_12, %c0_13] : memref<64x2xf32, #tpu.memory_space<vmem>>, vector<64x2xf32>
    %cst_14 = arith.constant dense<0.000000e+00> : vector<8x2xf32>
    %16 = tpu.matmul %14, %15, %cst_14 {dimension_numbers = #tpu.dot_dimension_numbers<[1], [0], [0], [1], [0, 0, 1, 1], [], []>} : vector<8x64xf32>, vector<64x2xf32>, vector<8x2xf32> -> vector<8x2xf32>
    %c0_15 = arith.constant 0 : index
    %c0_16 = arith.constant 0 : index
    %17 = vector.load %arg7[%c0_15, %c0_16] : memref<1x2xf32, #tpu.memory_space<vmem>>, vector<1x2xf32>
    %18 = vector.broadcast %17 : vector<1x2xf32> to vector<8x2xf32>
    %19 = arith.addf %16, %18 : vector<8x2xf32>
    %c0_17 = arith.constant 0 : index
    %c0_18 = arith.constant 0 : index
    %20 = vector.load %arg8[%c0_17, %c0_18] : memref<8x2xf32, #tpu.memory_space<vmem>>, vector<8x2xf32>
    tpu.vector_store %arg8[%c0_17, %c0_18], %19 {strides = array<i32>} : memref<8x2xf32, #tpu.memory_space<vmem>>, vector<8x2xf32>,
    return
  }
  func.func @transform_0(%arg0: i32) -> (i32, i32) {
    %c0_i32 = arith.constant 0 : i32
    %c0_i32_0 = arith.constant 0 : i32
    return %arg0, %c0_i32 : i32, i32
  }
  func.func @transform_1(%arg0: i32) -> (i32, i32) {
    %c0_i32 = arith.constant 0 : i32
    %c0_i32_0 = arith.constant 0 : i32
    %c0_i32_1 = arith.constant 0 : i32
    return %c0_i32, %c0_i32_0 : i32, i32
  }
  func.func @transform_2(%arg0: i32) -> (i32, i32) {
    %c0_i32 = arith.constant 0 : i32
    %c0_i32_0 = arith.constant 0 : i32
    %c0_i32_1 = arith.constant 0 : i32
    return %c0_i32, %c0_i32_0 : i32, i32
  }
  func.func @transform_3(%arg0: i32) -> (i32, i32) {
    %c0_i32 = arith.constant 0 : i32
    %c0_i32_0 = arith.constant 0 : i32
    %c0_i32_1 = arith.constant 0 : i32
    return %c0_i32, %c0_i32_0 : i32, i32
  }
  func.func @transform_4(%arg0: i32) -> (i32, i32) {
    %c0_i32 = arith.constant 0 : i32
    %c0_i32_0 = arith.constant 0 : i32
    %c0_i32_1 = arith.constant 0 : i32
    return %c0_i32, %c0_i32_0 : i32, i32
  }
  func.func @transform_5(%arg0: i32) -> (i32, i32) {
    %c0_i32 = arith.constant 0 : i32
    %c0_i32_0 = arith.constant 0 : i32
    %c0_i32_1 = arith.constant 0 : i32
    return %c0_i32, %c0_i32_0 : i32, i32
  }
  func.func @transform_6(%arg0: i32) -> (i32, i32) {
    %c0_i32 = arith.constant 0 : i32
    %c0_i32_0 = arith.constant 0 : i32
    %c0_i32_1 = arith.constant 0 : i32
    return %c0_i32, %c0_i32_0 : i32, i32
  }
  func.func @transform_7(%arg0: i32) -> (i32, i32) {
    %c0_i32 = arith.constant 0 : i32
    %c0_i32_0 = arith.constant 0 : i32
    return %arg0, %c0_i32 : i32, i32
  }
}

</mosaic_0001>

<bundles_post_ra>
// kernel: tpu_custom_call.1
= control target key start
LH: loop header
LB: loop body
LE: loop exit
PB: predicated region body
PF: predicated region fallthrough
CT: control target
= control target key end

     0   :  { %12 = vsyncpa [#allocation3], 0  ;;  %s439_s24 = smov [#allocation2]   ;;  %s563_s0 = inlined_call_operand.vmem [shape: f32[8,16], index: 0, kind: input, shape index: {}]   ;;  %s564_s1 = inlined_call_operand.hbm [shape: f32[16,64], index: 1, kind: input, shape index: {}]   ;;  %s565_s2 = inlined_call_operand.vmem [shape: f32[1,64], index: 2, kind: input, shape index: {}]   ;;  %s566_s3 = inlined_call_operand.vmem [shape: f32[64,64], index: 3, kind: input, shape index: {}]   ;;  %s567_s4 = inlined_call_operand.vmem [shape: f32[1,64], index: 4, kind: input, shape index: {}]   ;;  %s568_s5 = inlined_call_operand.vmem [shape: f32[64,2], index: 5, kind: input, shape index: {}]   ;;  %s569_s6 = inlined_call_operand.vmem [shape: f32[1,2], index: 6, kind: input, shape index: {}]   ;;  %s570_s7 = inlined_call_operand.vmem [shape: f32[8,2], index: 7, kind: output, shape index: {}]  }
   0x1   :  { %s20_s25 = sshll.u32 %s439_s24, 4  ;;  %s415_s28 = scalar_lea.hbm %s564_s1, 256  ;;  %s21_s25 = int_to_ptr.vmem [resolvable:$true] %s20_s25 }
   0x2   :  { %p416_p0 = scmp.ne.s32.totalorder %s564_s1, %s415_s28  ;;  %p419_p1 = scmp.lt.u32.totalorder %s415_s28, %s564_s1 }
   0x4   :  { %p421_p2 = pnand %p419_p1, %p416_p0 }
   0x6   :  { %424 = shalt.err (!%p421_p2)
}
   0x7   :  { %s425_s10 = scalar_lea.vmem %s21_s25, 256  ;;  %p430_p4 = scmp.lt.s32.totalorder %s21_s25, %s21_s25 }
   0x8   :  { %p426_p3 = scmp.ne.s32.totalorder %s21_s25, %s425_s10  ;;  %p431_p5 = scmp.lt.s32.totalorder %s425_s10, %s425_s10 }
   0xa   :  { %p432_p6 = por %p431_p5, %p430_p4 }
   0xc   :  { %p433_p7 = pnand %p432_p6, %p426_p3 }
   0xe   :  { %436 = shalt.err (!%p433_p7)
}
   0xf   :  { %s440_s11 = smov 128   ;;  %s441_s12 = smov 8  }
  0x10   :  { %26 = dma.hbm_to_vmem [thread:$0]  %s564_s1, 256, %s21_s25, [#allocation3], %s440_s11, %s440_s11, %s441_s12  }
  0x11   :  { %437 = dma.done.wait [#allocation3], 256  }
  0x12   :  { %438 = vsyncadd [#allocation3], 4294967040  ;;  %v442_v0 = vmov 0.0|0.0   ;;  %vm443_vm0 = vmmov 0   ;;  %v444_v1 = vmov 0.0   ;;  %v41_v2 = vld [vmem:[#allocation2] sm:$0xff] }
  0x13   :  { %382 = vmatprep.subr.bf16.mxu0 %v442_v0  ;;  %341 = vmatprep.mubr.msk.f32.mxu0 %vm443_vm0, %v444_v1  ;;  %v42_v3 = vld [vmem:[#allocation2 + $0x8] sm:$0xff]  ;;  %v125_v5 = vld [vmem:[%s566_s3] sm:$0xff]  ;;  %v127_v7 = vld [vmem:[%s566_s3 + $0x10] sm:$0xff]  ;;  %vm50_vm1 = vcmask 130048   ;;  %vm140_vm2 = vcmask 523264   ;;  %vm303_vm3 = vcmask 15360  }
  0x14   :  { %385 = vmatprep.subr.bf16.mxu1 %v442_v0  ;;  %360 = vmatprep.mubr.msk.f32.mxu1 %vm443_vm0, %v444_v1  ;;  %v383_v4 = vpack.c.bf16 %v42_v3, %v41_v2  ;;  %v126_v6 = vld [vmem:[%s566_s3 + $0x8] sm:$0xff]  ;;  %v128_v9 = vld [vmem:[%s566_s3 + $0x18] sm:$0xff]  ;;  %v40_v10 = vld [vmem:[%s563_s0] sm:$0xff] }
  0x15   :  { %v386_v8 = vpack.c.bf16 %v126_v6, %v125_v5  ;;  %v389_v11 = vpack.c.bf16 %v128_v9, %v127_v7  ;;  %v129_v12 = vld [vmem:[%s566_s3 + $0x20] sm:$0xff]  ;;  %v130_v13 = vld [vmem:[%s566_s3 + $0x28] sm:$0xff]  ;;  %v131_v15 = vld [vmem:[%s566_s3 + $0x30] sm:$0xff] }
  0x16   :  { %384 = vmatpush3.bf16.msra.mxu0 %v383_v4  ;;  %v392_v14 = vpack.c.bf16 %v130_v13, %v129_v12  ;;  %v132_v16 = vld [vmem:[%s566_s3 + $0x38] sm:$0xff]  ;;  %v215_v18 = vld [vmem:[%s568_s5] sm:$0xff]  ;;  %v216_v19 = vld [vmem:[%s568_s5 + $0x8] sm:$0xff] }
  0x17   :  { %387 = vmatpush3.bf16.msra.mxu1 %v386_v8  ;;  %397 = vmatprep.subr.bf16.mxu0 %v442_v0  ;;  %v395_v17 = vpack.c.bf16 %v132_v16, %v131_v15  ;;  %v217_v20 = vld [vmem:[%s568_s5 + $0x10] sm:$0xff]  ;;  %v398_v21 = vpack.c.bf16 %v216_v19, %v215_v18  ;;  %v218_v22 = vld [vmem:[%s568_s5 + $0x18] sm:$0xff]  ;;  %v219_v24 = vld [vmem:[%s568_s5 + $0x20] sm:$0xff] }
  0x18   :  { %388 = vmatprep.subr.bf16.mxu1 %v442_v0  ;;  %v401_v23 = vpack.c.bf16 %v218_v22, %v217_v20  ;;  %v220_v25 = vld [vmem:[%s568_s5 + $0x28] sm:$0xff]  ;;  %v310_v27 = vld [vmem:[%s565_s2] ss:$0 sm:$0xff]  ;;  %v221_v32 = vld [vmem:[%s568_s5 + $0x30] sm:$0xff] }
  0x19   :  { %342 = vmatmul.mubr.msk.f32.vlgmr.msra.gmra.mrb[0].mxu0 %vm50_vm1, %v40_v10  ;;  %v404_v26 = vpack.c.bf16 %v220_v25, %v219_v24  ;;  %v222_v33 = vld [vmem:[%s568_s5 + $0x38] sm:$0xff]  ;;  %v312_v35 = vld [vmem:[%s567_s4] ss:$0 sm:$0xff] }
  0x1a   :  { %379 = vmatprep.mubr.msk.f32.mxu0 %vm443_vm0, %v444_v1  ;;  %399 = vmatpush3.bf16.msra.mxu0 %v398_v21  ;;  %v407_v34 = vpack.c.bf16 %v222_v33, %v221_v32  ;;  %v314_v40 = vld [vmem:[%s569_s6] ss:$0 sm:$0xff] }
  0x1b   :  { %390 = vmatpush3.bf16.msra.mxu1 %v389_v11  ;;  %400 = vmatprep.subr.bf16.mxu0 %v442_v0 }
  0x1c   :  { %391 = vmatprep.subr.bf16.mxu1 %v442_v0 }
  0x1e   :  { %402 = vmatpush3.bf16.msra.mxu0 %v401_v23 }
  0x1f   :  { %393 = vmatpush3.bf16.msra.mxu1 %v392_v14  ;;  %403 = vmatprep.subr.bf16.mxu0 %v442_v0 }
  0x20   :  { %394 = vmatprep.subr.bf16.mxu1 %v442_v0 }
  0x22   :  { %405 = vmatpush3.bf16.msra.mxu0 %v404_v26 }
  0x23   :  { %396 = vmatpush3.bf16.msra.mxu1 %v395_v17  ;;  %406 = vmatprep.subr.bf16.mxu0 %v442_v0 }
  0x26   :  { %408 = vmatpush3.bf16.msra.mxu0 %v407_v34 }
  0xec   :  { %v120_v28 = vpop.f32.mrb[0].mxu0 }
  0xed   :  { %v121_v29 = vadd.f32 %v310_v27, %v120_v28  ;;  %v343_v30 = vpop.f32.mrb[1].mxu0 }
  0xef   :  { %v124_v31 = vmax.f32 %v121_v29, 0.0 }
  0xf1   :  { %361 = vmatmul.mubr.msk.f32.vlgmr.msra.gmra.mrb[0].mxu1 %vm140_vm2, %v124_v31 }
 0x1c4   :  { %v210_v36 = vpop.f32.mrb[0].mxu1 }
 0x1c5   :  { %v211_v37 = vadd.f32 %v312_v35, %v210_v36  ;;  %v362_v38 = vpop.f32.mrb[1].mxu1 }
 0x1c7   :  { %v214_v39 = vmax.f32 %v211_v37, 0.0 }
 0x1c9   :  { %380 = vmatmul.mubr.msk.f32.vlgmr.msra.gmra.mrb[2].mxu0 %vm140_vm2, %v214_v39 }
 0x29c   :  { %v299_v41 = vpop.f32.mrb[2].mxu0 }
 0x29d   :  { %v300_v42 = vadd.f32 %v314_v40, %v299_v41  ;;  %v381_v43 = vpop.f32.mrb[3].mxu0 }
 0x29f   :  { %304 = vst.msk [vmem:[%s570_s7] sm:$0xff] %vm303_vm3, %v300_v42 }
 0x2a0   :  { %309 = vsyncpa [#allocation3], 1 }

</bundles_post_ra>
